<compile_context>
chip_gen: v5e
topology: v5e:2x2
jax: 0.10.0
libtpu: 0.0.40
codegen_flags: <defaults>
</compile_context>

<pallas_src>
import functools

import jax
import jax.numpy as jnp
from jax.experimental import pallas as pl
from jax.experimental.pallas import tpu as pltpu

LANES = 128          # lane width of the fused head matmuls
_MIN_SPLIT_B = 2048  # force >=2 grid steps (v7x dual-TC) once B reaches this


# ------------------------- Pallas kernel -------------------------

def _prediction_kernel(x_ref,
                       w1_ref, b1_ref,       # startBlock Linear(32->64)
                       w2_ref, b2_ref,       # startBlock Linear(64->64)
                       wf_ref, bf_ref,       # fused [policy | value_hidden] (64->128)
                       wv2_ref, bv2_ref,     # placed value Linear (128->128)
                       p_ref, v_ref,         # (tile_b, A), (tile_b, S)
                       *, action_size, support_size):
    x = x_ref[...]

    # startBlock
    h = jnp.dot(x, w1_ref[...], preferred_element_type=jnp.float32) + b1_ref[...]
    h = jnp.maximum(h, 0.0)
    h = jnp.dot(h, w2_ref[...], preferred_element_type=jnp.float32) + b2_ref[...]
    h = jnp.maximum(h, 0.0)

    # Fused heads matmul: lanes [0,A) policy logits, lanes [A,A+64) value hidden.
    heads = jnp.dot(h, wf_ref[...], preferred_element_type=jnp.float32) + bf_ref[...]

    # Policy logits: narrow store (lanes [0, A)).
    p_ref[...] = heads[:, :action_size].astype(p_ref.dtype)

    # Value head: whole-tile ReLU is exact because wv2_ref has zero rows for
    # the policy / padding lanes; placed matmul emits value at lanes [0, S).
    vh = jnp.maximum(heads, 0.0)
    val = jnp.dot(vh, wv2_ref[...], preferred_element_type=jnp.float32) + bv2_ref[...]
    v_ref[...] = val[:, :support_size].astype(v_ref.dtype)


# ------------------------- helpers -------------------------

def _round_up(n, m):
    return ((n + m - 1) // m) * m


def pack_params(params):
    """Pack head layers into lane-dense 'placed' weights.  Call ONCE at load."""
    hidden = params["w2"].shape[1]                 # 64
    action_size = params["wp"].shape[1]
    support_size = params["wv2"].shape[1]
    assert action_size + hidden <= LANES, "action_size too large for fused head"
    assert support_size <= LANES, "value support exceeds 128 lanes"

    wf = jnp.zeros((hidden, LANES), jnp.float32)
    wf = wf.at[:, :action_size].set(params["wp"].astype(jnp.float32))
    wf = wf.at[:, action_size:action_size + hidden].set(params["wv1"].astype(jnp.float32))

    bf = jnp.zeros((1, LANES), jnp.float32)
    bf = bf.at[:, :action_size].set(params["bp"].astype(jnp.float32))
    bf = bf.at[:, action_size:action_size + hidden].set(params["bv1"].astype(jnp.float32))

    # Placed value layer: rows [A, A+64) (value-hidden lanes) -> cols [0, S).
    wv2p = jnp.zeros((LANES, LANES), jnp.float32)
    wv2p = wv2p.at[action_size:action_size + hidden,
                   :support_size].set(params["wv2"].astype(jnp.float32))

    bv2p = jnp.zeros((1, LANES), jnp.float32)
    bv2p = bv2p.at[:, :support_size].set(params["bv2"].astype(jnp.float32))

    return dict(w1=params["w1"].astype(jnp.float32), b1=params["b1"].astype(jnp.float32),
                w2=params["w2"].astype(jnp.float32), b2=params["b2"].astype(jnp.float32),
                wf=wf, bf=bf, wv2p=wv2p, bv2p=bv2p)


# ------------------------- pallas_call wrapper -------------------------

def _prediction_pallas(x, packed, action_size, support_size, tile_b_max):
    B, in_dim = x.shape
    hidden = packed["w2"].shape[1]

    # Grid first, then tile size -> padding waste < 8 rows per grid step.
    grid_n = max(1, -(-B // tile_b_max))
    if grid_n < 2 and B >= _MIN_SPLIT_B:
        grid_n = 2                       # v7x: let both TensorCores get a block
    tile_b = _round_up(-(-B // grid_n), 8)
    b_pad = grid_n * tile_b
    if b_pad != B:
        x = jnp.pad(x, ((0, b_pad - B), (0, 0)))

    flops = 2 * b_pad * (in_dim * hidden + hidden * hidden
                         + hidden * LANES + LANES * LANES)
    bytes_accessed = 4 * (b_pad * in_dim                         # x read
                          + b_pad * (action_size + support_size)  # narrow outputs
                          + in_dim * hidden + hidden * hidden     # weights
                          + hidden * LANES + LANES * LANES
                          + 2 * hidden + 2 * LANES)

    kernel = functools.partial(_prediction_kernel,
                               action_size=action_size,
                               support_size=support_size)

    p_out, v_out = pl.pallas_call(
        kernel,
        out_shape=(jax.ShapeDtypeStruct((b_pad, action_size), jnp.float32),
                   jax.ShapeDtypeStruct((b_pad, support_size), jnp.float32)),
        grid_spec=pltpu.PrefetchScalarGridSpec(
            num_scalar_prefetch=0,
            grid=(grid_n,),
            in_specs=[
                pl.BlockSpec((tile_b, in_dim), lambda i: (i, 0)),   # x
                pl.BlockSpec((in_dim, hidden), lambda i: (0, 0)),   # w1 (resident)
                pl.BlockSpec((1, hidden), lambda i: (0, 0)),        # b1
                pl.BlockSpec((hidden, hidden), lambda i: (0, 0)),   # w2
                pl.BlockSpec((1, hidden), lambda i: (0, 0)),        # b2
                pl.BlockSpec((hidden, LANES), lambda i: (0, 0)),    # wf fused heads
                pl.BlockSpec((1, LANES), lambda i: (0, 0)),         # bf
                pl.BlockSpec((LANES, LANES), lambda i: (0, 0)),     # wv2 placed
                pl.BlockSpec((1, LANES), lambda i: (0, 0)),         # bv2 placed
            ],
            out_specs=[
                pl.BlockSpec((tile_b, action_size), lambda i: (i, 0)),   # policy
                pl.BlockSpec((tile_b, support_size), lambda i: (i, 0)),  # value
            ],
        ),
        compiler_params=pltpu.CompilerParams(
            dimension_semantics=("parallel",)),
        cost_estimate=pl.CostEstimate(flops=flops, transcendentals=0,
                                      bytes_accessed=bytes_accessed),
    )(x, packed["w1"], packed["b1"], packed["w2"], packed["b2"],
      packed["wf"], packed["bf"], packed["wv2p"], packed["bv2p"])

    if b_pad != B:
        p_out = p_out[:B]
        v_out = v_out[:B]
    return p_out, v_out


def make_prediction_fn(params, *, tile_b_max=4096):
    """Pack weights once and return a jitted (x) -> (p, v) forward."""
    action_size = params["wp"].shape[1]
    support_size = params["wv2"].shape[1]
    packed = pack_params(params)   # built once, becomes jit constants

    @jax.jit
    def fn(x):
        return _prediction_pallas(x, packed, action_size, support_size, tile_b_max)

    return fn


def prediction_function(x, params, *, tile_b_max=4096):
    """Convenience one-shot call (prefer make_prediction_fn for repeated use)."""
    packed = pack_params(params)
    action_size = params["wp"].shape[1]
    support_size = params["wv2"].shape[1]
    return _prediction_pallas(x, packed, action_size, support_size, tile_b_max)


# ------------------------- Parameter init -------------------------

def init_params(key, in_dim=32, hidden=64, action_size=2, support_size=21):
    """Deterministic synthetic init (PyTorch-like uniform fan-in scaling)."""
    def linear(key, fan_in, fan_out):
        kw, kb = jax.random.split(key)
        bound = 1.0 / jnp.sqrt(fan_in)
        w = jax.random.uniform(kw, (fan_in, fan_out), jnp.float32, -bound, bound)
        b = jax.random.uniform(kb, (1, fan_out), jnp.float32, -bound, bound)
        return w, b

    keys = jax.random.split(key, 5)
    w1, b1 = linear(keys[0], in_dim, hidden)
    w2, b2 = linear(keys[1], hidden, hidden)
    wp, bp = linear(keys[2], hidden, action_size)
    wv1, bv1 = linear(keys[3], hidden, hidden)
    wv2, bv2 = linear(keys[4], hidden, support_size)
    return dict(w1=w1, b1=b1, w2=w2, b2=b2,
                wp=wp, bp=bp, wv1=wv1, bv1=bv1, wv2=wv2, bv2=bv2)


# ------------------------- Reference (pure JAX) -------------------------

def prediction_reference(x, p):
    h = jnp.maximum(x @ p["w1"] + p["b1"], 0.0)
    h = jnp.maximum(h @ p["w2"] + p["b2"], 0.0)
    pol = h @ p["wp"] + p["bp"]
    vh = jnp.maximum(h @ p["wv1"] + p["bv1"], 0.0)
    val = vh @ p["wv2"] + p["bv2"]
    return pol, val


if __name__ == "__main__":
    key = jax.random.PRNGKey(0)
    k_params, k_x = jax.random.split(key)

    B = 8                      # small batch
    IN_DIM = 32                # matches Linear(32, 64)
    ACTION_SIZE = 2            # CartPole action space
    SUPPORT_SIZE = 21          # value_support.size (synthetic)

    params = init_params(k_params, in_dim=IN_DIM, hidden=64,
                         action_size=ACTION_SIZE, support_size=SUPPORT_SIZE)
    x = jax.random.normal(k_x, (B, IN_DIM), jnp.float32)

    predict = make_prediction_fn(params)   # packs weights once, jitted
    p_out, v_out = predict(x)
    p_out = jax.block_until_ready(p_out)
    v_out = jax.block_until_ready(v_out)

    p_ref, v_ref = prediction_reference(x, params)
    assert p_out.shape == (B, ACTION_SIZE)
    assert v_out.shape == (B, SUPPORT_SIZE)
    assert jnp.allclose(p_out, p_ref, atol=1e-5, rtol=1e-5)
    assert jnp.allclose(v_out, v_ref, atol=1e-5, rtol=1e-5)

    print("KERNEL_OK")
</pallas_src>

<mosaic_0001>
module attributes {stable_mosaic.version = 11 : i64} {
  func.func @_prediction_kernel(%arg0: i32, %arg1: memref<8x32xf32, #tpu.memory_space<vmem>>, %arg2: memref<32x64xf32, #tpu.memory_space<vmem>>, %arg3: memref<1x64xf32, #tpu.memory_space<vmem>>, %arg4: memref<64x64xf32, #tpu.memory_space<vmem>>, %arg5: memref<1x64xf32, #tpu.memory_space<vmem>>, %arg6: memref<64x128xf32, #tpu.memory_space<vmem>>, %arg7: memref<1x128xf32, #tpu.memory_space<vmem>>, %arg8: memref<128x128xf32, #tpu.memory_space<vmem>>, %arg9: memref<1x128xf32, #tpu.memory_space<vmem>>, %arg10: memref<8x2xf32, #tpu.memory_space<vmem>>, %arg11: memref<8x21xf32, #tpu.memory_space<vmem>>) attributes {dimension_semantics = [#tpu.dimension_semantics<parallel>], iteration_bounds = array<i64: 1>, scalar_prefetch = 0 : i64, scratch_operands = 0 : i64, tpu.core_type = #tpu.core_type<tc>, window_params = [{transform_indices = @transform_0, window_bounds = array<i64: 8, 32>}, {pipeline_mode = #tpu.pipeline_mode<synchronous>, transform_indices = @transform_1, window_bounds = array<i64: 32, 64>}, {pipeline_mode = #tpu.pipeline_mode<synchronous>, transform_indices = @transform_2, window_bounds = array<i64: 1, 64>}, {pipeline_mode = #tpu.pipeline_mode<synchronous>, transform_indices = @transform_3, window_bounds = array<i64: 64, 64>}, {pipeline_mode = #tpu.pipeline_mode<synchronous>, transform_indices = @transform_4, window_bounds = array<i64: 1, 64>}, {pipeline_mode = #tpu.pipeline_mode<synchronous>, transform_indices = @transform_5, window_bounds = array<i64: 64, 128>}, {pipeline_mode = #tpu.pipeline_mode<synchronous>, transform_indices = @transform_6, window_bounds = array<i64: 1, 128>}, {pipeline_mode = #tpu.pipeline_mode<synchronous>, transform_indices = @transform_7, window_bounds = array<i64: 128, 128>}, {pipeline_mode = #tpu.pipeline_mode<synchronous>, transform_indices = @transform_8, window_bounds = array<i64: 1, 128>}, {transform_indices = @transform_9, window_bounds = array<i64: 8, 2>}, {transform_indices = @transform_10, window_bounds = array<i64: 8, 21>}]} {
    %c0 = arith.constant 0 : index
    %c0_0 = arith.constant 0 : index
    %0 = vector.load %arg1[%c0, %c0_0] : memref<8x32xf32, #tpu.memory_space<vmem>>, vector<8x32xf32>
    %c0_1 = arith.constant 0 : index
    %c0_2 = arith.constant 0 : index
    %1 = vector.load %arg2[%c0_1, %c0_2] : memref<32x64xf32, #tpu.memory_space<vmem>>, vector<32x64xf32>
    %cst = arith.constant dense<0.000000e+00> : vector<8x64xf32>
    %2 = tpu.matmul %0, %1, %cst {dimension_numbers = #tpu.dot_dimension_numbers<[1], [0], [0], [1], [0, 0, 1, 1], [], []>} : vector<8x32xf32>, vector<32x64xf32>, vector<8x64xf32> -> vector<8x64xf32>
    %c0_3 = arith.constant 0 : index
    %c0_4 = arith.constant 0 : index
    %3 = vector.load %arg3[%c0_3, %c0_4] : memref<1x64xf32, #tpu.memory_space<vmem>>, vector<1x64xf32>
    %4 = vector.broadcast %3 : vector<1x64xf32> to vector<8x64xf32>
    %5 = arith.addf %2, %4 : vector<8x64xf32>
    %cst_5 = arith.constant 0.000000e+00 : f32
    %6 = vector.broadcast %cst_5 : f32 to vector<8x64xf32>
    %7 = arith.maximumf %5, %6 : vector<8x64xf32>
    %c0_6 = arith.constant 0 : index
    %c0_7 = arith.constant 0 : index
    %8 = vector.load %arg4[%c0_6, %c0_7] : memref<64x64xf32, #tpu.memory_space<vmem>>, vector<64x64xf32>
    %cst_8 = arith.constant dense<0.000000e+00> : vector<8x64xf32>
    %9 = tpu.matmul %7, %8, %cst_8 {dimension_numbers = #tpu.dot_dimension_numbers<[1], [0], [0], [1], [0, 0, 1, 1], [], []>} : vector<8x64xf32>, vector<64x64xf32>, vector<8x64xf32> -> vector<8x64xf32>
    %c0_9 = arith.constant 0 : index
    %c0_10 = arith.constant 0 : index
    %10 = vector.load %arg5[%c0_9, %c0_10] : memref<1x64xf32, #tpu.memory_space<vmem>>, vector<1x64xf32>
    %11 = vector.broadcast %10 : vector<1x64xf32> to vector<8x64xf32>
    %12 = arith.addf %9, %11 : vector<8x64xf32>
    %cst_11 = arith.constant 0.000000e+00 : f32
    %13 = vector.broadcast %cst_11 : f32 to vector<8x64xf32>
    %14 = arith.maximumf %12, %13 : vector<8x64xf32>
    %c0_12 = arith.constant 0 : index
    %c0_13 = arith.constant 0 : index
    %15 = vector.load %arg6[%c0_12, %c0_13] : memref<64x128xf32, #tpu.memory_space<vmem>>, vector<64x128xf32>
    %cst_14 = arith.constant dense<0.000000e+00> : vector<8x128xf32>
    %16 = tpu.matmul %14, %15, %cst_14 {dimension_numbers = #tpu.dot_dimension_numbers<[1], [0], [0], [1], [0, 0, 1, 1], [], []>} : vector<8x64xf32>, vector<64x128xf32>, vector<8x128xf32> -> vector<8x128xf32>
    %c0_15 = arith.constant 0 : index
    %c0_16 = arith.constant 0 : index
    %17 = vector.load %arg7[%c0_15, %c0_16] : memref<1x128xf32, #tpu.memory_space<vmem>>, vector<1x128xf32>
    %18 = vector.broadcast %17 : vector<1x128xf32> to vector<8x128xf32>
    %19 = arith.addf %16, %18 : vector<8x128xf32>
    %20 = vector.extract_strided_slice %19 {offsets = [0, 0], sizes = [8, 2], strides = [1, 1]} : vector<8x128xf32> to vector<8x2xf32>
    %c0_17 = arith.constant 0 : index
    %c0_18 = arith.constant 0 : index
    %21 = vector.load %arg10[%c0_17, %c0_18] : memref<8x2xf32, #tpu.memory_space<vmem>>, vector<8x2xf32>
    tpu.vector_store %arg10[%c0_17, %c0_18], %20 {strides = array<i32>} : memref<8x2xf32, #tpu.memory_space<vmem>>, vector<8x2xf32>,
    %cst_19 = arith.constant 0.000000e+00 : f32
    %22 = vector.broadcast %cst_19 : f32 to vector<8x128xf32>
    %23 = arith.maximumf %19, %22 : vector<8x128xf32>
    %c0_20 = arith.constant 0 : index
    %c0_21 = arith.constant 0 : index
    %24 = vector.load %arg8[%c0_20, %c0_21] : memref<128x128xf32, #tpu.memory_space<vmem>>, vector<128x128xf32>
    %cst_22 = arith.constant dense<0.000000e+00> : vector<8x128xf32>
    %25 = tpu.matmul %23, %24, %cst_22 {dimension_numbers = #tpu.dot_dimension_numbers<[1], [0], [0], [1], [0, 0, 1, 1], [], []>} : vector<8x128xf32>, vector<128x128xf32>, vector<8x128xf32> -> vector<8x128xf32>
    %c0_23 = arith.constant 0 : index
    %c0_24 = arith.constant 0 : index
    %26 = vector.load %arg9[%c0_23, %c0_24] : memref<1x128xf32, #tpu.memory_space<vmem>>, vector<1x128xf32>
    %27 = vector.broadcast %26 : vector<1x128xf32> to vector<8x128xf32>
    %28 = arith.addf %25, %27 : vector<8x128xf32>
    %29 = vector.extract_strided_slice %28 {offsets = [0, 0], sizes = [8, 21], strides = [1, 1]} : vector<8x128xf32> to vector<8x21xf32>
    %c0_25 = arith.constant 0 : index
    %c0_26 = arith.constant 0 : index
    %30 = vector.load %arg11[%c0_25, %c0_26] : memref<8x21xf32, #tpu.memory_space<vmem>>, vector<8x21xf32>
    tpu.vector_store %arg11[%c0_25, %c0_26], %29 {strides = array<i32>} : memref<8x21xf32, #tpu.memory_space<vmem>>, vector<8x21xf32>,
    return
  }
  func.func @transform_0(%arg0: i32) -> (i32, i32) {
    %c0_i32 = arith.constant 0 : i32
    %c0_i32_0 = arith.constant 0 : i32
    return %arg0, %c0_i32 : i32, i32
  }
  func.func @transform_1(%arg0: i32) -> (i32, i32) {
    %c0_i32 = arith.constant 0 : i32
    %c0_i32_0 = arith.constant 0 : i32
    %c0_i32_1 = arith.constant 0 : i32
    return %c0_i32, %c0_i32_0 : i32, i32
  }
  func.func @transform_2(%arg0: i32) -> (i32, i32) {
    %c0_i32 = arith.constant 0 : i32
    %c0_i32_0 = arith.constant 0 : i32
    %c0_i32_1 = arith.constant 0 : i32
    return %c0_i32, %c0_i32_0 : i32, i32
  }
  func.func @transform_3(%arg0: i32) -> (i32, i32) {
    %c0_i32 = arith.constant 0 : i32
    %c0_i32_0 = arith.constant 0 : i32
    %c0_i32_1 = arith.constant 0 : i32
    return %c0_i32, %c0_i32_0 : i32, i32
  }
  func.func @transform_4(%arg0: i32) -> (i32, i32) {
    %c0_i32 = arith.constant 0 : i32
    %c0_i32_0 = arith.constant 0 : i32
    %c0_i32_1 = arith.constant 0 : i32
    return %c0_i32, %c0_i32_0 : i32, i32
  }
  func.func @transform_5(%arg0: i32) -> (i32, i32) {
    %c0_i32 = arith.constant 0 : i32
    %c0_i32_0 = arith.constant 0 : i32
    %c0_i32_1 = arith.constant 0 : i32
    return %c0_i32, %c0_i32_0 : i32, i32
  }
  func.func @transform_6(%arg0: i32) -> (i32, i32) {
    %c0_i32 = arith.constant 0 : i32
    %c0_i32_0 = arith.constant 0 : i32
    %c0_i32_1 = arith.constant 0 : i32
    return %c0_i32, %c0_i32_0 : i32, i32
  }
  func.func @transform_7(%arg0: i32) -> (i32, i32) {
    %c0_i32 = arith.constant 0 : i32
    %c0_i32_0 = arith.constant 0 : i32
    %c0_i32_1 = arith.constant 0 : i32
    return %c0_i32, %c0_i32_0 : i32, i32
  }
  func.func @transform_8(%arg0: i32) -> (i32, i32) {
    %c0_i32 = arith.constant 0 : i32
    %c0_i32_0 = arith.constant 0 : i32
    %c0_i32_1 = arith.constant 0 : i32
    return %c0_i32, %c0_i32_0 : i32, i32
  }
  func.func @transform_9(%arg0: i32) -> (i32, i32) {
    %c0_i32 = arith.constant 0 : i32
    %c0_i32_0 = arith.constant 0 : i32
    return %arg0, %c0_i32 : i32, i32
  }
  func.func @transform_10(%arg0: i32) -> (i32, i32) {
    %c0_i32 = arith.constant 0 : i32
    %c0_i32_0 = arith.constant 0 : i32
    return %arg0, %c0_i32 : i32, i32
  }
}

</mosaic_0001>

<bundles_post_ra>
// kernel: fn.1
= control target key start
LH: loop header
LB: loop body
LE: loop exit
PB: predicated region body
PF: predicated region fallthrough
CT: control target
= control target key end

     0   :  { %16 = vsyncpa [#allocation3], 0  ;;  %s605_s0 = inlined_call_operand.hbm [shape: f32[8,32], index: 0, kind: input, shape index: {}]   ;;  %s606_s1 = inlined_call_operand.hbm [shape: f32[32,64], index: 1, kind: input, shape index: {}]   ;;  %s607_s2 = inlined_call_operand.hbm [shape: f32[1,64], index: 2, kind: input, shape index: {}]   ;;  %s608_s3 = inlined_call_operand.hbm [shape: f32[64,64], index: 3, kind: input, shape index: {}]   ;;  %s609_s4 = inlined_call_operand.vmem [shape: f32[1,64], index: 4, kind: input, shape index: {}]   ;;  %s610_s5 = inlined_call_operand.hbm [shape: f32[64,128], index: 5, kind: input, shape index: {}]   ;;  %s611_s6 = inlined_call_operand.vmem [shape: f32[1,128], index: 6, kind: input, shape index: {}]   ;;  %s612_s7 = inlined_call_operand.hbm [shape: f32[128,128], index: 7, kind: input, shape index: {}]   ;;  %s613_s8 = inlined_call_operand.vmem [shape: f32[1,128], index: 8, kind: input, shape index: {}]   ;;  %s614_s9 = inlined_call_operand.vmem [shape: f32[8,2], index: 9, kind: output, shape index: {0}]   ;;  %s615_s10 = inlined_call_operand.hbm [shape: f32[8,21], index: 10, kind: output, shape index: {1}]  }
   0x1   :  { %17 = vsyncpa [#allocation6], 0 }
   0x2   :  { %18 = vsyncpa [#allocation9], 0 }
   0x3   :  { %19 = vsyncpa [#allocation12], 0  ;;  %s36_s15 = sshll.u32 %s606_s1, 4  ;;  %s37_s15 = int_to_ptr.hbm [resolvable:$true] %s36_s15 }
   0x4   :  { %20 = vsyncpa [#allocation4], 0  ;;  %s494_s16 = smov [#allocation5]   ;;  %s60_s20 = sshll.u32 %s608_s3, 4  ;;  %s61_s20 = int_to_ptr.hbm [resolvable:$true] %s60_s20 }
   0x5   :  { %s38_s17 = sshll.u32 %s494_s16, 4  ;;  %s495_s21 = smov 128   ;;  %s39_s17 = int_to_ptr.vmem [resolvable:$true] %s38_s17 }
   0x6   :  { %s496_s22 = smov 8   ;;  %s497_s23 = smov [#allocation8]  }
   0x7   :  { %44 = dma.hbm_to_vmem [thread:$0]  %s37_s15, 512, %s39_s17, [#allocation6], %s495_s21, %s495_s21, %s496_s22  }
   0x8   :  { %s62_s24 = sshll.u32 %s497_s23, 4  ;;  %s26_s26 = sshll.u32 %s605_s0, 4  ;;  %s63_s24 = int_to_ptr.vmem [resolvable:$true] %s62_s24  ;;  %s27_s26 = int_to_ptr.hbm [resolvable:$true] %s26_s26 }
   0x9   :  { %68 = dma.hbm_to_vmem [thread:$0]  %s61_s20, 1024, %s63_s24, [#allocation9], %s495_s21, %s495_s21, %s496_s22  }
   0xa   :  { %s50_s28 = sshll.u32 %s607_s2, 4  ;;  %s498_s29 = smov [#allocation2]   ;;  %s51_s28 = int_to_ptr.hbm [resolvable:$true] %s50_s28 }
   0xb   :  { %s28_s30 = sshll.u32 %s498_s29, 4  ;;  %s499_s11 = smov [#allocation7]   ;;  %s29_s30 = int_to_ptr.vmem [resolvable:$true] %s28_s30 }
   0xc   :  { %31 = dma.hbm_to_vmem [thread:$0]  %s27_s26, 128, %s29_s30, [#allocation3]  }
   0xd   :  { %s52_s12 = sshll.u32 %s499_s11, 4  ;;  %s75_s0 = sshll.u32 %s610_s5, 4  ;;  %s53_s12 = int_to_ptr.vmem [resolvable:$true] %s52_s12  ;;  %s76_s0 = int_to_ptr.hbm [resolvable:$true] %s75_s0 }
   0xe   :  { %55 = dma.hbm_to_vmem [thread:$0]  %s51_s28, 16, %s53_s12, [#allocation6]  }
   0xf   :  { %s90_s17 = sshll.u32 %s612_s7, 4  ;;  %s500_s18 = smov [#allocation10]   ;;  %s91_s17 = int_to_ptr.hbm [resolvable:$true] %s90_s17 }
  0x10   :  { %s77_s2 = sshll.u32 %s500_s18, 4  ;;  %s501_s19 = smov [#allocation11]   ;;  %s78_s2 = int_to_ptr.vmem [resolvable:$true] %s77_s2 }
  0x11   :  { %83 = dma.hbm_to_vmem [thread:$0]  %s76_s0, 1024, %s78_s2, [#allocation9], %s495_s21, %s495_s21, %s496_s22  }
  0x12   :  { %s92_s20 = sshll.u32 %s501_s19, 4  ;;  %s93_s20 = int_to_ptr.vmem [resolvable:$true] %s92_s20 }
  0x13   :  { %98 = dma.hbm_to_vmem [thread:$0]  %s91_s17, 2048, %s93_s20, [#allocation12], %s495_s21, %s495_s21, %s496_s22  }
  0x14   :  { %484 = dma.done.wait [#allocation3], 128  }
  0x15   :  { %485 = vsyncadd [#allocation3], 4294967168 }
  0x16   :  { %486 = dma.done.wait [#allocation6], 528  }
  0x17   :  { %487 = vsyncadd [#allocation6], 4294966768 }
  0x18   :  { %488 = dma.done.wait [#allocation9], 2048  }
  0x19   :  { %489 = vsyncadd [#allocation9], 4294965248 }
  0x1a   :  { %490 = dma.done.wait [#allocation12], 2048  }
  0x1b   :  { %491 = vsyncadd [#allocation12], 4294965248  ;;  %v129_v0 = vld [vmem:[#allocation5 + $0x18] sm:$0xff]  ;;  %v128_v1 = vld [vmem:[#allocation5 + $0x10] sm:$0xff]  ;;  %vm134_vm0 = vcmask 261120   ;;  %vm171_vm1 = vcmask 523264  }
  0x1c   :  { %150 = vmatpush.msra.mxu0 %v129_v0  ;;  %v166_v2 = vld [vmem:[#allocation8 + $0x38] sm:$0xff]  ;;  %v127_v3 = vld [vmem:[#allocation5 + $0x8] sm:$0xff]  ;;  %v165_v4 = vld [vmem:[#allocation8 + $0x30] sm:$0xff]  ;;  %vm231_vm2 = vcmask 15360   ;;  %s502_s1 = smov [#allocation13]   ;;  %s285_s28 = sshll.u32 %s615_s10, 4  ;;  %s286_s28 = int_to_ptr.hbm [resolvable:$true] %s285_s28 }
  0x1d   :  { %183 = vmatpush.msra.mxu1 %v166_v2  ;;  %v126_v5 = vld [vmem:[#allocation5] sm:$0xff]  ;;  %v164_v6 = vld [vmem:[#allocation8 + $0x28] sm:$0xff]  ;;  %v125_v7 = vld [vmem:[#allocation2] sm:$0xff]  ;;  %s283_s26 = sshll.u32 %s502_s1, 4  ;;  %vm274_vm3 = vcmask 171008   ;;  %s284_s26 = int_to_ptr.vmem [resolvable:$true] %s283_s26 }
  0x1e   :  { %151 = vmatpush.msra.mxu0 %v128_v1  ;;  %v163_v8 = vld [vmem:[#allocation8 + $0x20] sm:$0xff]  ;;  %v162_v9 = vld [vmem:[#allocation8 + $0x18] sm:$0xff]  ;;  %v161_v10 = vld [vmem:[#allocation8 + $0x10] sm:$0xff] }
  0x1f   :  { %184 = vmatpush.msra.mxu1 %v165_v4  ;;  %v160_v11 = vld [vmem:[#allocation8 + $0x8] sm:$0xff]  ;;  %v159_v12 = vld [vmem:[#allocation8] sm:$0xff]  ;;  %v203_v13 = vld [vmem:[#allocation10 + $0x38] sm:$0xff] }
  0x20   :  { %152 = vmatpush.msra.mxu0 %v127_v3  ;;  %v202_v14 = vld [vmem:[#allocation10 + $0x30] sm:$0xff]  ;;  %219 = vmatpush.msra.mxu2 %v203_v13  ;;  %v201_v15 = vld [vmem:[#allocation10 + $0x28] sm:$0xff]  ;;  %v200_v16 = vld [vmem:[#allocation10 + $0x20] sm:$0xff] }
  0x21   :  { %185 = vmatpush.msra.mxu1 %v164_v6  ;;  %v199_v17 = vld [vmem:[#allocation10 + $0x18] sm:$0xff]  ;;  %v198_v22 = vld [vmem:[#allocation10 + $0x10] sm:$0xff]  ;;  %v197_v23 = vld [vmem:[#allocation10 + $0x8] sm:$0xff] }
  0x22   :  { %153 = vmatpush.msra.mxu0 %v126_v5  ;;  %220 = vmatpush.msra.mxu2 %v202_v14  ;;  %v312_v18 = vld [vmem:[#allocation7] ss:$0 sm:$0xff]  ;;  %v196_v24 = vld [vmem:[#allocation10] sm:$0xff]  ;;  %v248_v26 = vld [vmem:[#allocation11 + $0x70] sm:$0xff] }
  0x23   :  { %300 = vmatmul.msk.f32.vlgmr.msra.gmra.mxu0 %vm134_vm0, %v125_v7  ;;  %186 = vmatpush.msra.mxu1 %v163_v8  ;;  %v249_v25 = vld [vmem:[#allocation11 + $0x78] sm:$0xff]  ;;  %v247_v27 = vld [vmem:[#allocation11 + $0x68] sm:$0xff]  ;;  %v246_v28 = vld [vmem:[#allocation11 + $0x60] sm:$0xff] }
  0x24   :  { %221 = vmatpush.msra.mxu2 %v201_v15  ;;  %254 = vmatpush.msra.mxu3 %v249_v25  ;;  %v245_v29 = vld [vmem:[#allocation11 + $0x58] sm:$0xff]  ;;  %v244_v30 = vld [vmem:[#allocation11 + $0x50] sm:$0xff]  ;;  %v243_v31 = vld [vmem:[#allocation11 + $0x48] sm:$0xff] }
  0x25   :  { %187 = vmatpush.msra.mxu1 %v162_v9  ;;  %v242_v32 = vld [vmem:[#allocation11 + $0x40] sm:$0xff]  ;;  %v241_v33 = vld [vmem:[#allocation11 + $0x38] sm:$0xff]  ;;  %v240_v34 = vld [vmem:[#allocation11 + $0x30] sm:$0xff] }
  0x26   :  { %222 = vmatpush.msra.mxu2 %v200_v16  ;;  %255 = vmatpush.msra.mxu3 %v248_v26  ;;  %v239_v35 = vld [vmem:[#allocation11 + $0x28] sm:$0xff]  ;;  %v238_v36 = vld [vmem:[#allocation11 + $0x20] sm:$0xff]  ;;  %v237_v37 = vld [vmem:[#allocation11 + $0x18] sm:$0xff] }
  0x27   :  { %188 = vmatpush.msra.mxu1 %v161_v10  ;;  %v313_v38 = vld [vmem:[%s609_s4] ss:$0 sm:$0xff]  ;;  %v235_v43 = vld [vmem:[#allocation11 + $0x8] sm:$0xff]  ;;  %v234_v44 = vld [vmem:[#allocation11] sm:$0xff] }
  0x28   :  { %223 = vmatpush.msra.mxu2 %v199_v17  ;;  %256 = vmatpush.msra.mxu3 %v247_v27  ;;  %v236_v42 = vld [vmem:[#allocation11 + $0x10] sm:$0xff] }
  0x29   :  { %189 = vmatpush.msra.mxu1 %v160_v11  ;;  %v314_v45 = vld [vmem:[%s611_s6] ss:$0 sm:$0xff] }
  0x2a   :  { %224 = vmatpush.msra.mxu2 %v198_v22  ;;  %257 = vmatpush.msra.mxu3 %v246_v28  ;;  %v315_v49 = vld [vmem:[%s613_s8] ss:$0 sm:$0xff] }
  0x2b   :  { %190 = vmatpush.msra.mxu1 %v159_v12 }
  0x2c   :  { %225 = vmatpush.msra.mxu2 %v197_v23  ;;  %258 = vmatpush.msra.mxu3 %v245_v29 }
  0x2e   :  { %226 = vmatpush.msra.mxu2 %v196_v24  ;;  %259 = vmatpush.msra.mxu3 %v244_v30 }
  0x30   :  { %260 = vmatpush.msra.mxu3 %v243_v31 }
  0x32   :  { %261 = vmatpush.msra.mxu3 %v242_v32 }
  0x34   :  { %262 = vmatpush.msra.mxu3 %v241_v33 }
  0x36   :  { %263 = vmatpush.msra.mxu3 %v240_v34 }
  0x38   :  { %264 = vmatpush.msra.mxu3 %v239_v35 }
  0x3a   :  { %265 = vmatpush.msra.mxu3 %v238_v36 }
  0x3c   :  { %266 = vmatpush.msra.mxu3 %v237_v37 }
  0x3e   :  { %267 = vmatpush.msra.mxu3 %v236_v42 }
  0x40   :  { %268 = vmatpush.msra.mxu3 %v235_v43 }
  0x42   :  { %269 = vmatpush.msra.mxu3 %v234_v44 }
  0xa0   :  { %v155_v19 = vpop.f32.mrf.mxu0 }
  0xa1   :  { %v156_v20 = vadd.f32 %v312_v18, %v155_v19 }
  0xa3   :  { %v158_v21 = vmax.f32 %v156_v20, 0.0 }
  0xa5   :  { %301 = vmatmul.msk.f32.vlgmr.msra.gmra.mxu1 %vm171_vm1, %v158_v21 }
 0x122   :  { %v192_v39 = vpop.f32.mrf.mxu1 }
 0x123   :  { %v193_v40 = vadd.f32 %v313_v38, %v192_v39 }
 0x125   :  { %v195_v41 = vmax.f32 %v193_v40, 0.0 }
 0x127   :  { %302 = vmatmul.msk.f32.vlgmr.msra.gmra.mxu2 %vm171_vm1, %v195_v41 }
 0x1aa   :  { %v228_v46 = vpop.f32.mrf.mxu2 }
 0x1ab   :  { %v229_v47 = vadd.f32 %v314_v45, %v228_v46 }
 0x1ad   :  { %232 = vst.msk [vmem:[%s614_s9] sm:$0xff] %vm231_vm2, %v229_v47  ;;  %v233_v48 = vmax.f32 %v229_v47, 0.0 }
 0x1af   :  { %270 = vmatmul.f32.vlgmr.msra.gmra.mxu3 %v233_v48 }
 0x232   :  { %v271_v50 = vpop.f32.mrf.mxu3 }
 0x233   :  { %v272_v51 = vadd.f32 %v315_v49, %v271_v50 }
 0x235   :  { %275 = vst.msk [vmem:[#allocation13] sm:$0xff] %vm274_vm3, %v272_v51 }
 0x236   :  { %288 = dma.vmem_to_hbm [thread:$0]  %s284_s26, 128, %s286_s28, [#allocation4]  }
 0x237   :  { %492 = dma.done.wait [#allocation4], 128  }
 0x238   :  { %493 = vsyncadd [#allocation4], 4294967168 }
 0x239   :  { %295 = vsyncpa [#allocation3], 1 }
 0x23a   :  { %296 = vsyncpa [#allocation6], 1 }
 0x23b   :  { %297 = vsyncpa [#allocation9], 1 }
 0x23c   :  { %298 = vsyncpa [#allocation12], 1 }
 0x23d   :  { %299 = vsyncpa [#allocation4], 1 }

</bundles_post_ra>
